<compile_context>
chip_gen: v5e
topology: v5e:2x2
jax: 0.10.0
libtpu: 0.0.40
codegen_flags: <defaults>
</compile_context>

<pallas_src>
import functools

import jax
import jax.numpy as jnp
from jax import lax
from jax.experimental import pallas as pl
from jax.experimental.pallas import tpu as pltpu


def _debiased_pos_loss_kernel(lhs_ref, rhs_ref, rmod_col_ref, rmod_row_ref,
                              tgt_col_ref, tgt_row_ref,
                              loss_ref, full_acc, ng_acc, *,
                              tau_plus, drop_fn, batch_size, tn, acc_lanes):
    j = pl.program_id(1)                       # reduction (column-tile) axis

    @pl.when(j == 0)
    def _():
        full_acc[...] = jnp.zeros_like(full_acc)
        ng_acc[...] = jnp.zeros_like(ng_acc)

    # (TM, TN) tile of exp(out @ out.T / T).  LHS is pre-scaled by 1/T on the
    # host, so no in-kernel multiply; contract D of both operands directly.
    sims = lax.dot_general(
        lhs_ref[...], rhs_ref[...],
        dimension_numbers=(((1,), (1,)), ((), ())),
        preferred_element_type=jnp.float32)
    neg = jnp.exp(sims)                                     # (TM, TN) f32

    # Drop mask.  Self/pair columns satisfy (col % B == row % B); the row/col
    # mod-B vectors are precomputed on the host, so this is a single compare.
    drop = rmod_col_ref[...] == rmod_row_ref[...]           # (TM,1)==(1,TN)
    if drop_fn:
        t_col = tgt_col_ref[...]                            # (TM, 1) int32
        t_row = tgt_row_ref[...]                            # (1, TN) int32
        drop = drop | ((t_col == t_row) & (t_col != -1))
    ng = jnp.where(drop, jnp.float32(0.0), neg)

    # Lane-partial accumulation: lane-aligned 128-wide adds per tile; the
    # cross-lane (XLU) reduction happens only once, in the finalize block.
    def chunk_sum(vals):
        if acc_lanes == 128:
            part = vals[:, 0:128]
            for c in range(1, tn // 128):
                part = part + vals[:, c * 128:(c + 1) * 128]
            return part
        return jnp.sum(vals, axis=-1, keepdims=True)

    full_acc[...] += chunk_sum(neg)      # `full`: UNmasked row sums (as in ref)
    ng_acc[...] += chunk_sum(ng)         # `Ng`:  masked row sums

    @pl.when(j == pl.num_programs(1) - 1)
    def _():
        big_n = jnp.float32(2 * batch_size - 2)
        full = jnp.sum(full_acc[...], axis=-1, keepdims=True)
        ng_tot = jnp.sum(ng_acc[...], axis=-1, keepdims=True)
        o1 = full - (1.0 - tau_plus) * ng_tot
        o2 = full + (big_n * tau_plus - (1.0 - tau_plus)) * ng_tot
        loss_ref[...] = -jnp.log(o1 / o2)                   # per-row loss (TM, 1)


# Conservative working-set budget that fits the scoped-VMEM defaults of all
# three generations (v5e 16 MiB default can be raised via vmem_limit_bytes;
# v7x has 64 MiB physical / 32 MiB scoped default).
_VMEM_BUDGET_BYTES = 24 << 20


def _tile_candidates(n, caps):
    # Full extent first (always legal), then large multiples of 128 dividing n.
    return [n] + [t for t in caps if t < n and n % t == 0]


def _tile_usage_bytes(tm, tn, d, itemsize):
    return (2 * (tm + tn) * d * itemsize       # double-buffered operand blocks
            + 4 * tm * tn * 4                  # sims/exp/mask/where intermediates
            + 2 * tm * 128 * 4)                # lane-partial accumulators


def _pick_tiles(n2, d, itemsize, budget=_VMEM_BUDGET_BYTES):
    tn_cands = _tile_candidates(n2, (4096, 2048, 1024, 512, 256, 128))
    tm_cands = _tile_candidates(n2, (512, 256, 128))
    # Prefer collapsing the reduction axis (tn == n2), then the largest tm
    # (bigger tm cuts the per-row-stripe re-reads of the column operand).
    for tn in tn_cands:
        for tm in tm_cands:
            if _tile_usage_bytes(tm, tn, d, itemsize) <= budget:
                return tm, tn
    # TODO(synk): pad 2B up to a multiple of 128 for awkward sizes instead of
    # falling back to the smallest legal (possibly over-budget) tiling.
    return tm_cands[-1], tn_cands[-1]


def debiased_pos_loss_v2(out_1, out_2, out_m, target, *,
                         temperature, tau_plus, drop_fn,
                         tile_m=None, tile_n=None):
    """Forward pass of DebiasedPosLossV2. `out_m` is unused (as in the module)."""
    del out_m
    batch_size, d = out_1.shape
    n2 = 2 * batch_size
    inv_t = 1.0 / float(temperature)

    # LHS carries the 1/T scale (XLA fuses it with the concat); RHS stays raw.
    out_lhs = jnp.concatenate([out_1, out_2], axis=0) * inv_t           # (2B, D)
    out_rhs = jnp.concatenate([out_1, out_2], axis=0)                   # (2B, D)
    # TODO(synk): optionally cast out_lhs/out_rhs to bfloat16 for the MXU when
    # callers tolerate it; kept in the input dtype so the f32 check stays tight.

    rmod = jnp.arange(n2, dtype=jnp.int32) % batch_size
    rmod_col = rmod.reshape(n2, 1)
    rmod_row = rmod.reshape(1, n2)
    tgt = jnp.concatenate([target, target], axis=0).astype(jnp.int32)
    tgt_col = tgt.reshape(n2, 1)
    tgt_row = tgt.reshape(1, n2)

    itemsize = jnp.dtype(out_lhs.dtype).itemsize
    tm, tn = _pick_tiles(n2, d, itemsize)
    if tile_m is not None:
        tm = tile_m
    if tile_n is not None:
        tn = tile_n
    assert n2 % tm == 0 and n2 % tn == 0, (n2, tm, tn)
    acc_lanes = 128 if (tn % 128 == 0 and tn >= 128) else 1
    n_row_tiles = n2 // tm

    kernel = functools.partial(
        _debiased_pos_loss_kernel,
        tau_plus=float(tau_plus),
        drop_fn=bool(drop_fn),
        batch_size=int(batch_size),
        tn=int(tn),
        acc_lanes=int(acc_lanes),
    )

    # Truthful traffic estimate: the column operand (and the tiny row/target
    # vectors) are re-read once per row-tile stripe.
    bytes_accessed = (n2 * d * itemsize                      # LHS read once
                      + n_row_tiles * n2 * d * itemsize      # RHS per row stripe
                      + n_row_tiles * 4 * n2 * 4             # rmod/target vectors
                      + n2 * 4)                              # per-row loss write

    per_row = pl.pallas_call(
        kernel,
        out_shape=jax.ShapeDtypeStruct((n2, 1), jnp.float32),
        grid_spec=pltpu.PrefetchScalarGridSpec(
            num_scalar_prefetch=0,
            grid=(n2 // tm, n2 // tn),          # (row tiles, reduction tiles)
            in_specs=[
                pl.BlockSpec((tm, d), lambda i, j: (i, 0)),   # scaled row block
                pl.BlockSpec((tn, d), lambda i, j: (j, 0)),   # raw column block
                pl.BlockSpec((tm, 1), lambda i, j: (i, 0)),   # row (idx % B)
                pl.BlockSpec((1, tn), lambda i, j: (0, j)),   # col (idx % B)
                pl.BlockSpec((tm, 1), lambda i, j: (i, 0)),   # row targets
                pl.BlockSpec((1, tn), lambda i, j: (0, j)),   # col targets
            ],
            out_specs=pl.BlockSpec((tm, 1), lambda i, j: (i, 0)),
            scratch_shapes=[pltpu.VMEM((tm, acc_lanes), jnp.float32),
                            pltpu.VMEM((tm, acc_lanes), jnp.float32)],
        ),
        # Row axis is fully independent; on v7x one may promote it to
        # CORE_PARALLEL if a profile shows an idle TensorCore.
        compiler_params=pltpu.CompilerParams(
            dimension_semantics=("parallel", "arbitrary"),
            vmem_limit_bytes=48 * 1024 * 1024),
        cost_estimate=pl.CostEstimate(
            flops=2 * n2 * n2 * d,
            transcendentals=n2 * n2,
            bytes_accessed=int(bytes_accessed)),
    )(out_lhs, out_rhs, rmod_col, rmod_row, tgt_col, tgt_row)

    # Final scalar mean over the 2B per-row losses (tiny XLA reduction).
    return jnp.mean(per_row)


def _reference_loss(out_1, out_2, target, *, temperature, tau_plus, drop_fn):
    """Pure-JAX reference mirroring the PyTorch module (for sanity check)."""
    b = out_1.shape[0]
    n = 2 * b - 2
    out = jnp.concatenate([out_1, out_2], axis=0).astype(jnp.float32)
    neg = jnp.exp(out @ out.T / temperature)
    full = neg.sum(axis=-1)
    if drop_fn:
        t = jnp.concatenate([target, target], axis=0).reshape(-1, 1)
        tmask = (t == t.T) & (t != -1)
        neg = jnp.where(tmask, 0.0, neg)
    r = jnp.arange(2 * b)[:, None]
    c = jnp.arange(2 * b)[None, :]
    neg_mask = (c % b) != (r % b)
    ng = jnp.where(neg_mask, neg, 0.0).sum(axis=-1)
    o1 = full - (1 - tau_plus) * ng
    o2 = full + (n * tau_plus - (1 - tau_plus)) * ng
    return (-jnp.log(o1 / o2)).mean()


def _make_inputs(key, b, d):
    k1, k2, k3, k4 = jax.random.split(key, 4)
    out_1 = jax.random.normal(k1, (b, d), dtype=jnp.float32)
    out_2 = jax.random.normal(k2, (b, d), dtype=jnp.float32)
    out_1 = out_1 / jnp.linalg.norm(out_1, axis=-1, keepdims=True)
    out_2 = out_2 / jnp.linalg.norm(out_2, axis=-1, keepdims=True)
    out_m = jax.random.normal(k3, (b, d), dtype=jnp.float32)   # unused by the loss
    target = jax.random.randint(k4, (b,), -1, 4, dtype=jnp.int32)
    return out_1, out_2, out_m, target


if __name__ == "__main__":
    temperature = 0.5
    tau_plus = 0.1

    key = jax.random.PRNGKey(0)
    k_small, k_big = jax.random.split(key, 2)

    # Small case (single tile, 2B = 8): B=4, D=32 -- exercise drop_fn both ways.
    out_1, out_2, out_m, target = _make_inputs(k_small, 4, 32)
    target = jnp.array([0, 1, 0, -1], dtype=jnp.int32)
    for drop_fn in (True, False):
        loss = debiased_pos_loss_v2(
            out_1, out_2, out_m, target,
            temperature=temperature, tau_plus=tau_plus, drop_fn=drop_fn)
        loss = jax.block_until_ready(loss)
        ref = _reference_loss(out_1, out_2, target, temperature=temperature,
                              tau_plus=tau_plus, drop_fn=drop_fn)
        assert jnp.allclose(loss, ref, rtol=1e-4, atol=1e-4), (drop_fn, loss, ref)

    # Larger case, B=192 -> 2B=384.  Default tiling collapses the reduction
    # axis (grid (1, 1)); the forced 128x128 tiling exercises the accumulator /
    # lane-partial reduction path across a 3x3 grid.
    out_1, out_2, out_m, target = _make_inputs(k_big, 192, 32)
    ref = _reference_loss(out_1, out_2, target, temperature=temperature,
                          tau_plus=tau_plus, drop_fn=True)
    for tiles in (dict(), dict(tile_m=128, tile_n=128)):
        loss = debiased_pos_loss_v2(
            out_1, out_2, out_m, target,
            temperature=temperature, tau_plus=tau_plus, drop_fn=True, **tiles)
        loss = jax.block_until_ready(loss)
        assert jnp.allclose(loss, ref, rtol=1e-4, atol=1e-4), (tiles, loss, ref)

    print("KERNEL_OK")
</pallas_src>

<mosaic_0001>
module attributes {stable_mosaic.version = 11 : i64} {
  func.func @_debiased_pos_loss_kernel(%arg0: i32, %arg1: i32, %arg2: memref<8x32xf32, #tpu.memory_space<vmem>>, %arg3: memref<8x32xf32, #tpu.memory_space<vmem>>, %arg4: memref<8x1xi32, #tpu.memory_space<vmem>>, %arg5: memref<1x8xi32, #tpu.memory_space<vmem>>, %arg6: memref<8x1xi32, #tpu.memory_space<vmem>>, %arg7: memref<1x8xi32, #tpu.memory_space<vmem>>, %arg8: memref<8x1xf32, #tpu.memory_space<vmem>>, %arg9: memref<8x1xf32, #tpu.memory_space<vmem>>, %arg10: memref<8x1xf32, #tpu.memory_space<vmem>>) attributes {dimension_semantics = [#tpu.dimension_semantics<parallel>, #tpu.dimension_semantics<arbitrary>], iteration_bounds = array<i64: 1, 1>, scalar_prefetch = 0 : i64, scratch_operands = 2 : i64, tpu.core_type = #tpu.core_type<tc>, window_params = [{transform_indices = @transform_0, window_bounds = array<i64: 8, 32>}, {transform_indices = @transform_1, window_bounds = array<i64: 8, 32>}, {transform_indices = @transform_2, window_bounds = array<i64: 8, 1>}, {transform_indices = @transform_3, window_bounds = array<i64: 1, 8>}, {transform_indices = @transform_4, window_bounds = array<i64: 8, 1>}, {transform_indices = @transform_5, window_bounds = array<i64: 1, 8>}, {transform_indices = @transform_6, window_bounds = array<i64: 8, 1>}]} {
    %c0_i32 = arith.constant 0 : i32
    %0 = arith.cmpi eq, %arg1, %c0_i32 : i32
    %1 = arith.extui %0 : i1 to i32
    %c0_i32_0 = arith.constant 0 : i32
    %2 = arith.cmpi ne, %1, %c0_i32_0 : i32
    scf.if %2 {
      %cst_25 = arith.constant 0.000000e+00 : f32
      %37 = vector.broadcast %cst_25 : f32 to vector<8x1xf32>
      %c0_26 = arith.constant 0 : index
      %c0_27 = arith.constant 0 : index
      %38 = vector.load %arg9[%c0_26, %c0_27] : memref<8x1xf32, #tpu.memory_space<vmem>>, vector<8x1xf32>
      tpu.vector_store %arg9[%c0_26, %c0_27], %37 {strides = array<i32>} : memref<8x1xf32, #tpu.memory_space<vmem>>, vector<8x1xf32>,
      %cst_28 = arith.constant 0.000000e+00 : f32
      %39 = vector.broadcast %cst_28 : f32 to vector<8x1xf32>
      %c0_29 = arith.constant 0 : index
      %c0_30 = arith.constant 0 : index
      %40 = vector.load %arg10[%c0_29, %c0_30] : memref<8x1xf32, #tpu.memory_space<vmem>>, vector<8x1xf32>
      tpu.vector_store %arg10[%c0_29, %c0_30], %39 {strides = array<i32>} : memref<8x1xf32, #tpu.memory_space<vmem>>, vector<8x1xf32>,
    } else {
    }
    %c0 = arith.constant 0 : index
    %c0_1 = arith.constant 0 : index
    %3 = vector.load %arg2[%c0, %c0_1] : memref<8x32xf32, #tpu.memory_space<vmem>>, vector<8x32xf32>
    %c0_2 = arith.constant 0 : index
    %c0_3 = arith.constant 0 : index
    %4 = vector.load %arg3[%c0_2, %c0_3] : memref<8x32xf32, #tpu.memory_space<vmem>>, vector<8x32xf32>
    %cst = arith.constant dense<0.000000e+00> : vector<8x8xf32>
    %5 = tpu.matmul %3, %4, %cst {dimension_numbers = #tpu.dot_dimension_numbers<[1], [1], [0], [0], [0, 0, 1, 0], [], []>} : vector<8x32xf32>, vector<8x32xf32>, vector<8x8xf32> -> vector<8x8xf32>
    %6 = math.exp %5 : vector<8x8xf32>
    %c0_4 = arith.constant 0 : index
    %c0_5 = arith.constant 0 : index
    %7 = vector.load %arg4[%c0_4, %c0_5] : memref<8x1xi32, #tpu.memory_space<vmem>>, vector<8x1xi32>
    %c0_6 = arith.constant 0 : index
    %c0_7 = arith.constant 0 : index
    %8 = vector.load %arg5[%c0_6, %c0_7] : memref<1x8xi32, #tpu.memory_space<vmem>>, vector<1x8xi32>
    %9 = vector.broadcast %7 : vector<8x1xi32> to vector<8x8xi32>
    %10 = vector.broadcast %8 : vector<1x8xi32> to vector<8x8xi32>
    %11 = arith.cmpi eq, %9, %10 : vector<8x8xi32>
    %c0_8 = arith.constant 0 : index
    %c0_9 = arith.constant 0 : index
    %12 = vector.load %arg6[%c0_8, %c0_9] : memref<8x1xi32, #tpu.memory_space<vmem>>, vector<8x1xi32>
    %c0_10 = arith.constant 0 : index
    %c0_11 = arith.constant 0 : index
    %13 = vector.load %arg7[%c0_10, %c0_11] : memref<1x8xi32, #tpu.memory_space<vmem>>, vector<1x8xi32>
    %14 = vector.broadcast %12 : vector<8x1xi32> to vector<8x8xi32>
    %15 = vector.broadcast %13 : vector<1x8xi32> to vector<8x8xi32>
    %16 = arith.cmpi eq, %14, %15 : vector<8x8xi32>
    %c-1_i32 = arith.constant -1 : i32
    %17 = vector.broadcast %c-1_i32 : i32 to vector<8x1xi32>
    %18 = arith.cmpi ne, %12, %17 : vector<8x1xi32>
    %19 = vector.broadcast %18 : vector<8x1xi1> to vector<8x8xi1>
    %20 = arith.andi %16, %19 : vector<8x8xi1>
    %21 = arith.ori %11, %20 : vector<8x8xi1>
    %cst_12 = arith.constant 0.000000e+00 : f32
    %22 = vector.broadcast %cst_12 : f32 to vector<8x8xf32>
    %23 = arith.select %21, %22, %6 : vector<8x8xi1>, vector<8x8xf32>
    %c0_13 = arith.constant 0 : index
    %c0_14 = arith.constant 0 : index
    %24 = vector.load %arg9[%c0_13, %c0_14] : memref<8x1xf32, #tpu.memory_space<vmem>>, vector<8x1xf32>
    %cst_15 = arith.constant dense<0.000000e+00> : vector<8xf32>
    %25 = vector.multi_reduction <add>, %6, %cst_15 [1] : vector<8x8xf32> to vector<8xf32>
    %26 = vector.shape_cast %25 : vector<8xf32> to vector<8x1xf32>
    %27 = arith.addf %24, %26 : vector<8x1xf32>
    %c0_16 = arith.constant 0 : index
    %c0_17 = arith.constant 0 : index
    %28 = vector.load %arg9[%c0_16, %c0_17] : memref<8x1xf32, #tpu.memory_space<vmem>>, vector<8x1xf32>
    tpu.vector_store %arg9[%c0_16, %c0_17], %27 {strides = array<i32>} : memref<8x1xf32, #tpu.memory_space<vmem>>, vector<8x1xf32>,
    %c0_18 = arith.constant 0 : index
    %c0_19 = arith.constant 0 : index
    %29 = vector.load %arg10[%c0_18, %c0_19] : memref<8x1xf32, #tpu.memory_space<vmem>>, vector<8x1xf32>
    %cst_20 = arith.constant dense<0.000000e+00> : vector<8xf32>
    %30 = vector.multi_reduction <add>, %23, %cst_20 [1] : vector<8x8xf32> to vector<8xf32>
    %31 = vector.shape_cast %30 : vector<8xf32> to vector<8x1xf32>
    %32 = arith.addf %29, %31 : vector<8x1xf32>
    %c0_21 = arith.constant 0 : index
    %c0_22 = arith.constant 0 : index
    %33 = vector.load %arg10[%c0_21, %c0_22] : memref<8x1xf32, #tpu.memory_space<vmem>>, vector<8x1xf32>
    tpu.vector_store %arg10[%c0_21, %c0_22], %32 {strides = array<i32>} : memref<8x1xf32, #tpu.memory_space<vmem>>, vector<8x1xf32>,
    %c0_i32_23 = arith.constant 0 : i32
    %34 = arith.cmpi eq, %arg1, %c0_i32_23 : i32
    %35 = arith.extui %34 : i1 to i32
    %c0_i32_24 = arith.constant 0 : i32
    %36 = arith.cmpi ne, %35, %c0_i32_24 : i32
    scf.if %36 {
      %c0_25 = arith.constant 0 : index
      %c0_26 = arith.constant 0 : index
      %37 = vector.load %arg9[%c0_25, %c0_26] : memref<8x1xf32, #tpu.memory_space<vmem>>, vector<8x1xf32>
      %cst_27 = arith.constant dense<0.000000e+00> : vector<8xf32>
      %38 = vector.multi_reduction <add>, %37, %cst_27 [1] : vector<8x1xf32> to vector<8xf32>
      %39 = vector.shape_cast %38 : vector<8xf32> to vector<8x1xf32>
      %c0_28 = arith.constant 0 : index
      %c0_29 = arith.constant 0 : index
      %40 = vector.load %arg10[%c0_28, %c0_29] : memref<8x1xf32, #tpu.memory_space<vmem>>, vector<8x1xf32>
      %cst_30 = arith.constant dense<0.000000e+00> : vector<8xf32>
      %41 = vector.multi_reduction <add>, %40, %cst_30 [1] : vector<8x1xf32> to vector<8xf32>
      %42 = vector.shape_cast %41 : vector<8xf32> to vector<8x1xf32>
      %cst_31 = arith.constant 0.899999976 : f32
      %43 = vector.broadcast %cst_31 : f32 to vector<8x1xf32>
      %44 = arith.mulf %43, %42 : vector<8x1xf32>
      %45 = arith.subf %39, %44 : vector<8x1xf32>
      %cst_32 = arith.constant 6.000000e+00 : f32
      %cst_33 = arith.constant 1.000000e-01 : f32
      %46 = arith.mulf %cst_32, %cst_33 : f32
      %cst_34 = arith.constant 0.899999976 : f32
      %47 = arith.subf %46, %cst_34 : f32
      %48 = vector.broadcast %47 : f32 to vector<8x1xf32>
      %49 = arith.mulf %48, %42 : vector<8x1xf32>
      %50 = arith.addf %39, %49 : vector<8x1xf32>
      %51 = arith.divf %45, %50 : vector<8x1xf32>
      %52 = math.log %51 : vector<8x1xf32>
      %cst_35 = arith.constant 0.000000e+00 : f32
      %53 = vector.broadcast %cst_35 : f32 to vector<8x1xf32>
      %54 = arith.subf %53, %52 : vector<8x1xf32>
      %c0_36 = arith.constant 0 : index
      %c0_37 = arith.constant 0 : index
      %55 = vector.load %arg8[%c0_36, %c0_37] : memref<8x1xf32, #tpu.memory_space<vmem>>, vector<8x1xf32>
      tpu.vector_store %arg8[%c0_36, %c0_37], %54 {strides = array<i32>} : memref<8x1xf32, #tpu.memory_space<vmem>>, vector<8x1xf32>,
    } else {
    }
    return
  }
  func.func @transform_0(%arg0: i32, %arg1: i32) -> (i32, i32) {
    %c0_i32 = arith.constant 0 : i32
    %c0_i32_0 = arith.constant 0 : i32
    return %arg0, %c0_i32 : i32, i32
  }
  func.func @transform_1(%arg0: i32, %arg1: i32) -> (i32, i32) {
    %c0_i32 = arith.constant 0 : i32
    %c0_i32_0 = arith.constant 0 : i32
    return %arg1, %c0_i32 : i32, i32
  }
  func.func @transform_2(%arg0: i32, %arg1: i32) -> (i32, i32) {
    %c0_i32 = arith.constant 0 : i32
    %c0_i32_0 = arith.constant 0 : i32
    return %arg0, %c0_i32 : i32, i32
  }
  func.func @transform_3(%arg0: i32, %arg1: i32) -> (i32, i32) {
    %c0_i32 = arith.constant 0 : i32
    %c0_i32_0 = arith.constant 0 : i32
    return %c0_i32, %arg1 : i32, i32
  }
  func.func @transform_4(%arg0: i32, %arg1: i32) -> (i32, i32) {
    %c0_i32 = arith.constant 0 : i32
    %c0_i32_0 = arith.constant 0 : i32
    return %arg0, %c0_i32 : i32, i32
  }
  func.func @transform_5(%arg0: i32, %arg1: i32) -> (i32, i32) {
    %c0_i32 = arith.constant 0 : i32
    %c0_i32_0 = arith.constant 0 : i32
    return %c0_i32, %arg1 : i32, i32
  }
  func.func @transform_6(%arg0: i32, %arg1: i32) -> (i32, i32) {
    %c0_i32 = arith.constant 0 : i32
    %c0_i32_0 = arith.constant 0 : i32
    return %arg0, %c0_i32 : i32, i32
  }
}

</mosaic_0001>

<bundles_post_ra>
// kernel: tpu_custom_call.1
= control target key start
LH: loop header
LB: loop body
LE: loop exit
PB: predicated region body
PF: predicated region fallthrough
CT: control target
= control target key end

     0   :  { %vm32_vm0 = vcmask 261120   ;;  %v146_v1 = vmov 0   ;;  %vm27_vm2 = vcmask 7168   ;;  %v147_v6 = vmov 0.0   ;;  %s211_s1 = inlined_call_operand.vmem [shape: f32[8,32], index: 1, kind: input, shape index: {}]   ;;  %s212_s0 = inlined_call_operand.vmem [shape: f32[8,32], index: 0, kind: input, shape index: {}]   ;;  %s213_s4 = inlined_call_operand.vmem [shape: s32[8,1], index: 4, kind: input, shape index: {}]   ;;  %s214_s2 = inlined_call_operand.vmem [shape: s32[8,1], index: 2, kind: input, shape index: {}]   ;;  %s215_s5 = inlined_call_operand.vmem [shape: s32[1,8], index: 5, kind: input, shape index: {}]   ;;  %s216_s3 = inlined_call_operand.vmem [shape: s32[1,8], index: 3, kind: input, shape index: {}]   ;;  %s217_s6 = inlined_call_operand.vmem [shape: f32[8,1], index: 6, kind: output, shape index: {}]  }
   0x1   :  { %v31_v0 = vld [vmem:[%s211_s1] sm:$0xff]  ;;  %136 = vset.pattern.permute.xlu0 %v146_v1  ;;  %137 = vset.pattern.permute.xlu1 %v146_v1  ;;  %28 = vst.msk [vmem:[#allocation2] sm:$0xff] %vm27_vm2, %v147_v6  ;;  %vm85_vm7 = vcmask 64512  }
   0x2   :  { %v68_v2 = vld [vmem:[%s213_s4] sm:$0xff]  ;;  %132 = vmatpush.xpose.msk.msra.mxu0 %vm32_vm0, %v31_v0  ;;  %29 = vst.msk [vmem:[#allocation3] sm:$0xff] %vm27_vm2, %v147_v6 }
   0x3   :  { %v30_v3 = vld [vmem:[%s212_s0] sm:$0xff]  ;;  %71 = vperm.xlu0 %136, %v68_v2   ;;  %vm75_vm1 = vcmp.ne.s32.totalorder %v68_v2, 4294967295 }
   0x4   :  { %v61_v4 = vld [vmem:[%s214_s2] sm:$0xff]  ;;  %v76_v5 = vsel %vm75_vm1, 1, %v146_v1 }
   0x5   :  { %64 = vperm.xlu1 %137, %v61_v4   ;;  %133 = vmatmul.msk.f32.vlgmr.msra.gmra.mxu0 %vm32_vm0, %v30_v3  ;;  %v138_v8 = vld [vmem:[%s215_s5] ss:$0 sm:$0xff] }
   0x6   :  { %v139_v12 = vld [vmem:[%s216_s3] ss:$0 sm:$0xff] }
   0x8   :  { %v84_v18 = vld [vmem:[#allocation2] sm:$0xff] }
   0x9   :  { %v92_v19 = vld [vmem:[#allocation3] sm:$0xff] }
   0xb   :  { %78 = vperm.xlu0 %136, %v76_v5  }
  0x75   :  { %v72_v7 = vpop.permute.xlu0 %71 }
  0x76   :  { %vm74_vm3 = vcmp.eq.s32.totalorder %v72_v7, %v138_v8 }
  0x77   :  { %v65_v13 = vpop.permute.xlu1 %64 }
  0x78   :  { %vm67_vm6 = vcmp.eq.s32.totalorder %v65_v13, %v139_v12 }
  0x7d   :  { %v79_v9 = vpop.permute.xlu0 %78 }
  0x7e   :  { %vm80_vm4 = vcmp.eq.s32.totalorder %v79_v9, 1 }
  0x7f   :  { %vm81_vm5 = vmand %vm74_vm3, %vm80_vm4 }
  0x80   :  { %vm82_vm8 = vmor %vm67_vm6, %vm81_vm5 }
  0x82   :  { %v56_v10 = vpop.f32.mrf.mxu0 }
  0x83   :  { %v59_v11 = vmul.f32 1.442695, %v56_v10 }
  0x85   :  { %140 = vpow2.f32 %v59_v11 }
  0x8b   :  { %v141_v14 = vpop.eup %140 }
  0x8c   :  { %v86_v15 = vsel %vm85_vm7, %v141_v14, 0.0  ;;  %v83_v16 = vsel %vm82_vm8, 0.0, %v141_v14 }
  0x8d   :  { %87 = vadd.xlane.f32.xlu2 %v86_v15  ;;  %v93_v17 = vsel %vm85_vm7, %v83_v16, 0.0 }
  0x8e   :  { %94 = vadd.xlane.f32.xlu1 %v93_v17 }
 0x100   :  { %v88_v20 = vpop.xlane.xlu2 %87 }
 0x101   :  { %v89_v21 = vadd.f32 %v88_v20, %v84_v18  ;;  %v95_v22 = vpop.xlane.xlu1 %94 }
 0x102   :  { %v96_v23 = vadd.f32 %v95_v22, %v92_v19 }
 0x103   :  { %91 = vst.msk [vmem:[#allocation2] sm:$0xff] %vm27_vm2, %v89_v21 }
 0x104   :  { %97 = vst.msk [vmem:[#allocation3] sm:$0xff] %vm27_vm2, %v96_v23 }
 0x10a   :  { %v101_v26 = vld [vmem:[#allocation2] sm:$0xff] }
 0x10b   :  { %v103_v24 = vld [vmem:[#allocation3] sm:$0xff] }
 0x10c   :  { %v107_v25 = vmul.f32 -0.29999995, %v103_v24  ;;  %v105_v32 = vmul.f32 0.9, %v103_v24 }
 0x10e   :  { %v108_v27 = vadd.f32 %v107_v25, %v101_v26  ;;  %v106_v37 = vsub.f32 %v101_v26, %v105_v32 }
 0x110   :  { %142 = vrcp.f32 %v108_v27  ;;  %v120_v31 = vand.u32 2147483648, %v108_v27  ;;  %v118_v34 = vand.u32 2147483647, %v108_v27  ;;  %vm114_vm10 = vweird.f32 %v108_v27 }
 0x112   :  { %v121_v36 = vor.u32 1.1754944e-38, %v120_v31  ;;  %vm119_vm12 = vcmp.eq.f32.partialorder %v118_v34, 8.507059e+37 }
 0x116   :  { %v143_v28 = vpop.eup %142 }
 0x117   :  { %v110_v29 = vmul.f32 %v143_v28, %v108_v27  ;;  %vm115_vm9 = vweird.f32 %v143_v28 }
 0x118   :  { %vm116_vm11 = vmor %vm114_vm10, %vm115_vm9 }
 0x119   :  { %v111_v30 = vsub.f32 1.0, %v110_v29 }
 0x11b   :  { %v112_v33 = vmul.f32 %v143_v28, %v111_v30 }
 0x11d   :  { %v113_v35 = vadd.f32 %v143_v28, %v112_v33 }
 0x11f   :  { %v117_v38 = vsel %vm116_vm11, %v143_v28, %v113_v35 }
 0x120   :  { %v122_v39 = vsel %vm119_vm12, %v121_v36, %v117_v38 }
 0x121   :  { %v123_v40 = vmul.f32 %v122_v39, %v106_v37 }
 0x123   :  { %144 = vlog2.f32 %v123_v40 }
 0x129   :  { %v145_v41 = vpop.eup %144 }
 0x12a   :  { %v125_v42 = vmul.f32 0.6931472, %v145_v41 }
 0x12c   :  { %v126_v43 = vsub.f32 0.0, %v125_v42 }
 0x12e   :  { %127 = vst.msk [vmem:[%s217_s6] sm:$0xff] %vm27_vm2, %v126_v43 }

</bundles_post_ra>
